<compile_context>
chip_gen: v5e
topology: v5e:2x2
jax: 0.10.0
libtpu: 0.0.40
codegen_flags: <defaults>
</compile_context>

<pallas_src>
import jax
import jax.numpy as jnp
from jax.experimental import pallas as pl
from jax.experimental.pallas import tpu as pltpu

# ----- configuration (matches module __init__ semantics) -----------------
E = 32                        # in_features
D = 16                        # dis_size
REL_DIM = 3 * E + 2 * D       # overlap=True, use_distance=True -> 128
HID = 512                     # hidden_dim in TwoLayerLinear (fixed in module)
NUM_REL = 16                  # relation_num
NREL_PAD = 128                # lane-dense padded relation dim (multiple of 128)

N, R, S = 2, 3, 8             # batch, relation pairs per batch, num spans
H, T, HT = 4, 4, 8            # head mentions, tail mentions, head-tail combos
NR = N * R
ROWS = NR * HT                # 48 total rows, multiple of 8 (sublane aligned)


# ----- Pallas kernel: one shot over the whole flattened problem -----------
def _aggregator_kernel(rel_ref, m_ref, w1_ref, b1_ref, w2_ref, b2_ref, o_ref):
    # rel_ref: (ROWS, REL_DIM)  masked rel-features (already * ht_comb_mask)
    # m_ref:   (ROWS, 1)        float mask
    # w1: (REL_DIM, HID) b1: (1, HID) w2: (HID, NREL_PAD) b2: (1, NREL_PAD)
    rel = rel_ref[...]

    # two-layer MLP, single K=128 and K=512 MXU contractions
    hid = jnp.maximum(
        jnp.dot(rel, w1_ref[...], preferred_element_type=jnp.float32)
        + b1_ref[...], 0.0)                                        # (ROWS, HID)
    logits = (jnp.dot(hid, w2_ref[...], preferred_element_type=jnp.float32)
              + b2_ref[...])                                       # (ROWS, NREL_PAD)

    # mask out invalid combos, then logsumexp over the HT axis per bag
    logits = logits - (1.0 - m_ref[...]) * 1e10
    lg = logits.reshape(NR, HT, NREL_PAD)
    mx = jnp.max(lg, axis=1)                                       # (NR, NREL_PAD)
    o_ref[...] = mx + jnp.log(jnp.sum(jnp.exp(lg - mx[:, None, :]), axis=1))


def _run_pallas(rel_flat, mask_flat, w1, b1, w2_pad, b2_pad):
    vmem = pl.BlockSpec(memory_space=pltpu.MemorySpace.VMEM)
    return pl.pallas_call(
        _aggregator_kernel,
        out_shape=jax.ShapeDtypeStruct((NR, NREL_PAD), jnp.float32),
        in_specs=[vmem] * 6,
        out_specs=vmem,
    )(rel_flat, mask_flat, w1, b1, w2_pad, b2_pad)


# ----- forward (gathers + feature assembly in plain JAX, MLP in kernel) ----
def _gather_inputs(params, mention_span_embeddings,
                   head_mentions_indices, head_mentions_indices_mask,
                   tail_mentions_indices, tail_mentions_indices_mask,
                   ht_comb_indices, ht_comb_mask, dis_h_2_t, dis_t_2_h):
    bsel = jax.vmap(lambda emb, idx: emb[idx])
    head = bsel(mention_span_embeddings, head_mentions_indices)          # (N,R,H,E)
    tail = bsel(mention_span_embeddings, tail_mentions_indices)          # (N,R,T,E)
    head = head * head_mentions_indices_mask[..., None].astype(jnp.float32)
    tail = tail * tail_mentions_indices_mask[..., None].astype(jnp.float32)
    head = head.reshape(NR, H, E)
    tail = tail.reshape(NR, T, E)

    h_idx = ht_comb_indices[..., 0].reshape(NR, HT)
    t_idx = ht_comb_indices[..., 1].reshape(NR, HT)
    att_head = bsel(head, h_idx)                                         # (NR,HT,E)
    att_tail = bsel(tail, t_idx)                                         # (NR,HT,E)

    dis_table = params["dis_embed"]                                      # (20, D)
    d1 = dis_table[dis_h_2_t.reshape(NR, HT)]                            # (NR,HT,D)
    d2 = dis_table[dis_t_2_h.reshape(NR, HT)]
    mask = ht_comb_mask.reshape(NR, HT, 1).astype(jnp.float32)
    return att_head, att_tail, d1, d2, mask


def _assemble_rel_features(params, *inputs):
    att_head, att_tail, d1, d2, mask = _gather_inputs(params, *inputs)
    rel = jnp.concatenate(
        [att_head, att_tail, att_head * att_tail, d1, d2], axis=-1)      # (NR,HT,128)
    rel = rel * mask
    return rel.reshape(ROWS, REL_DIM), mask.reshape(ROWS, 1)


def attender_aggregator_forward(params, *inputs):
    rel_flat, mask_flat = _assemble_rel_features(params, *inputs)
    # lane-dense W2/b2: zero-pad 16 -> 128 output lanes (exact; sliced below)
    w2_pad = jnp.zeros((HID, NREL_PAD), jnp.float32).at[:, :NUM_REL].set(params["w2"])
    b2_pad = jnp.zeros((1, NREL_PAD), jnp.float32).at[:, :NUM_REL].set(params["b2"])
    out = _run_pallas(rel_flat, mask_flat, params["w1"], params["b1"], w2_pad, b2_pad)
    return out[:, :NUM_REL].reshape(N, R, NUM_REL)


def attender_aggregator_reference(params, *inputs):
    att_head, att_tail, d1, d2, mask = _gather_inputs(params, *inputs)
    rel = jnp.concatenate([att_head, att_tail, att_head * att_tail, d1, d2], axis=-1)
    rel = rel * mask
    hid = jnp.maximum(rel @ params["w1"] + params["b1"], 0.0)
    logits = hid @ params["w2"] + params["b2"]
    logits = logits - (1.0 - mask) * 1e10
    out = jax.scipy.special.logsumexp(logits, axis=1)                    # over HT
    return out.reshape(N, R, NUM_REL)


# ----- deterministic parameter init ---------------------------------------
def init_params(key):
    k1, k2, k3, k4, k5 = jax.random.split(key, 5)
    dis_embed = 0.1 * jax.random.normal(k1, (20, D), jnp.float32)
    dis_embed = dis_embed.at[10].set(0.0)          # padding_idx=10
    w1 = 0.05 * jax.random.normal(k2, (REL_DIM, HID), jnp.float32)
    b1 = 0.01 * jax.random.normal(k3, (1, HID), jnp.float32)
    w2 = 0.05 * jax.random.normal(k4, (HID, NUM_REL), jnp.float32)
    b2 = 0.01 * jax.random.normal(k5, (1, NUM_REL), jnp.float32)
    return dict(dis_embed=dis_embed, w1=w1, b1=b1, w2=w2, b2=b2)


if __name__ == "__main__":
    key = jax.random.PRNGKey(0)
    kp, ke, k1, k2, k3, k4, k5, k6, k7, k8 = jax.random.split(key, 10)
    params = init_params(kp)

    mention_span_embeddings = jax.random.normal(ke, (N, S, E), jnp.float32)
    head_mentions_indices = jax.random.randint(k1, (N, R, H), 0, S)
    head_mentions_indices_mask = jax.random.randint(k2, (N, R, H), 0, 2)
    tail_mentions_indices = jax.random.randint(k3, (N, R, T), 0, S)
    tail_mentions_indices_mask = jax.random.randint(k4, (N, R, T), 0, 2)
    ht_comb_indices = jnp.stack(
        [jax.random.randint(k5, (N, R, HT), 0, H),
         jax.random.randint(k6, (N, R, HT), 0, T)], axis=-1)             # (N,R,HT,2)
    ht_comb_mask = jax.random.randint(k7, (N, R, HT), 0, 2)
    dis_h_2_t = jax.random.randint(k8, (N, R, HT), 0, 20)
    dis_t_2_h = (19 - dis_h_2_t)

    inputs = (mention_span_embeddings,
              head_mentions_indices, head_mentions_indices_mask,
              tail_mentions_indices, tail_mentions_indices_mask,
              ht_comb_indices, ht_comb_mask, dis_h_2_t, dis_t_2_h)

    out = attender_aggregator_forward(params, *inputs)
    out = jax.block_until_ready(out)

    ref = attender_aggregator_reference(params, *inputs)
    assert out.shape == (N, R, NUM_REL), out.shape
    assert jnp.allclose(out, ref, rtol=1e-4, atol=1e-4), (
        float(jnp.max(jnp.abs(out - ref))))

    # TODO(synk): MultiLayerMMA / TransformerEncoder branches (ML_MMA / ML_MA)
    # are external modules not shown; this kernel implements the NONE attenders.
    print("KERNEL_OK")
</pallas_src>

<mosaic_0001>
module attributes {stable_mosaic.version = 11 : i64} {
  func.func @_aggregator_kernel(%arg0: memref<48x128xf32, #tpu.memory_space<vmem>>, %arg1: memref<48x1xf32, #tpu.memory_space<vmem>>, %arg2: memref<128x512xf32, #tpu.memory_space<vmem>>, %arg3: memref<1x512xf32, #tpu.memory_space<vmem>>, %arg4: memref<512x128xf32, #tpu.memory_space<vmem>>, %arg5: memref<1x128xf32, #tpu.memory_space<vmem>>, %arg6: memref<6x128xf32, #tpu.memory_space<vmem>>) attributes {dimension_semantics = [], scalar_prefetch = 0 : i64, scratch_operands = 0 : i64, tpu.core_type = #tpu.core_type<tc>} {
    %c0 = arith.constant 0 : index
    %c0_0 = arith.constant 0 : index
    %0 = vector.load %arg0[%c0, %c0_0] : memref<48x128xf32, #tpu.memory_space<vmem>>, vector<48x128xf32>
    %c0_1 = arith.constant 0 : index
    %c0_2 = arith.constant 0 : index
    %1 = vector.load %arg2[%c0_1, %c0_2] : memref<128x512xf32, #tpu.memory_space<vmem>>, vector<128x512xf32>
    %cst = arith.constant dense<0.000000e+00> : vector<48x512xf32>
    %2 = tpu.matmul %0, %1, %cst {dimension_numbers = #tpu.dot_dimension_numbers<[1], [0], [0], [1], [0, 0, 1, 1], [], []>} : vector<48x128xf32>, vector<128x512xf32>, vector<48x512xf32> -> vector<48x512xf32>
    %c0_3 = arith.constant 0 : index
    %c0_4 = arith.constant 0 : index
    %3 = vector.load %arg3[%c0_3, %c0_4] : memref<1x512xf32, #tpu.memory_space<vmem>>, vector<1x512xf32>
    %4 = vector.broadcast %3 : vector<1x512xf32> to vector<48x512xf32>
    %5 = arith.addf %2, %4 : vector<48x512xf32>
    %cst_5 = arith.constant 0.000000e+00 : f32
    %6 = vector.broadcast %cst_5 : f32 to vector<48x512xf32>
    %7 = arith.maximumf %5, %6 : vector<48x512xf32>
    %c0_6 = arith.constant 0 : index
    %c0_7 = arith.constant 0 : index
    %8 = vector.load %arg4[%c0_6, %c0_7] : memref<512x128xf32, #tpu.memory_space<vmem>>, vector<512x128xf32>
    %cst_8 = arith.constant dense<0.000000e+00> : vector<48x128xf32>
    %9 = tpu.matmul %7, %8, %cst_8 {dimension_numbers = #tpu.dot_dimension_numbers<[1], [0], [0], [1], [0, 0, 1, 1], [], []>} : vector<48x512xf32>, vector<512x128xf32>, vector<48x128xf32> -> vector<48x128xf32>
    %c0_9 = arith.constant 0 : index
    %c0_10 = arith.constant 0 : index
    %10 = vector.load %arg5[%c0_9, %c0_10] : memref<1x128xf32, #tpu.memory_space<vmem>>, vector<1x128xf32>
    %11 = vector.broadcast %10 : vector<1x128xf32> to vector<48x128xf32>
    %12 = arith.addf %9, %11 : vector<48x128xf32>
    %c0_11 = arith.constant 0 : index
    %c0_12 = arith.constant 0 : index
    %13 = vector.load %arg1[%c0_11, %c0_12] : memref<48x1xf32, #tpu.memory_space<vmem>>, vector<48x1xf32>
    %cst_13 = arith.constant 1.000000e+00 : f32
    %14 = vector.broadcast %cst_13 : f32 to vector<48x1xf32>
    %15 = arith.subf %14, %13 : vector<48x1xf32>
    %cst_14 = arith.constant 1.000000e+10 : f32
    %16 = vector.broadcast %cst_14 : f32 to vector<48x1xf32>
    %17 = arith.mulf %15, %16 : vector<48x1xf32>
    %18 = vector.broadcast %17 : vector<48x1xf32> to vector<48x128xf32>
    %19 = arith.subf %12, %18 : vector<48x128xf32>
    %20 = vector.shape_cast %19 : vector<48x128xf32> to vector<6x8x128xf32>
    %cst_15 = arith.constant dense<0xFF800000> : vector<6x128xf32>
    %21 = vector.multi_reduction <maximumf>, %20, %cst_15 [1] : vector<6x8x128xf32> to vector<6x128xf32>
    %22 = vector.shape_cast %21 : vector<6x128xf32> to vector<6x1x128xf32>
    %23 = vector.broadcast %22 : vector<6x1x128xf32> to vector<6x8x128xf32>
    %24 = arith.subf %20, %23 : vector<6x8x128xf32>
    %25 = math.exp %24 : vector<6x8x128xf32>
    %cst_16 = arith.constant dense<0.000000e+00> : vector<6x128xf32>
    %26 = vector.multi_reduction <add>, %25, %cst_16 [1] : vector<6x8x128xf32> to vector<6x128xf32>
    %27 = math.log %26 : vector<6x128xf32>
    %28 = arith.addf %21, %27 : vector<6x128xf32>
    %c0_17 = arith.constant 0 : index
    %c0_18 = arith.constant 0 : index
    %29 = vector.load %arg6[%c0_17, %c0_18] : memref<6x128xf32, #tpu.memory_space<vmem>>, vector<6x128xf32>
    tpu.vector_store %arg6[%c0_17, %c0_18], %28 {strides = array<i32>} : memref<6x128xf32, #tpu.memory_space<vmem>>, vector<6x128xf32>,
    return
  }
}

</mosaic_0001>

<bundles_post_ra>
// kernel: tpu_custom_call.1
= control target key start
LH: loop header
LB: loop body
LE: loop exit
PB: predicated region body
PF: predicated region fallthrough
CT: control target
= control target key end

     0   :  { %11 = vsyncpa [#allocation3], 0  ;;  %s1017_s0 = inlined_call_operand.vmem [shape: f32[48,128], index: 0, kind: input, shape index: {}]   ;;  %s1018_s1 = inlined_call_operand.vmem [shape: f32[48,1], index: 1, kind: input, shape index: {}]   ;;  %s1019_s2 = inlined_call_operand.hbm [shape: f32[128,512], index: 2, kind: input, shape index: {}]   ;;  %s1020_s3 = inlined_call_operand.hbm [shape: f32[1,512], index: 3, kind: input, shape index: {}]   ;;  %s1021_s4 = inlined_call_operand.hbm [shape: f32[512,128], index: 4, kind: input, shape index: {}]   ;;  %s1022_s5 = inlined_call_operand.vmem [shape: f32[1,128], index: 5, kind: input, shape index: {}]   ;;  %s1023_s6 = inlined_call_operand.hbm [shape: f32[6,128], index: 6, kind: output, shape index: {}]  }
   0x1   :  { %12 = vsyncpa [#allocation6], 0  ;;  %s36_s23 = sshll.u32 %s1020_s3, 4  ;;  %s37_s23 = int_to_ptr.hbm [resolvable:$true] %s36_s23 }
   0x2   :  { %13 = vsyncpa [#allocation4], 0  ;;  %s858_s24 = smov [#allocation5]   ;;  %s22_s28 = sshll.u32 %s1019_s2, 4  ;;  %s23_s28 = int_to_ptr.hbm [resolvable:$true] %s22_s28 }
   0x3   :  { %s38_s25 = sshll.u32 %s858_s24, 4  ;;  %s859_s29 = smov [#allocation2]   ;;  %s39_s25 = int_to_ptr.vmem [resolvable:$true] %s38_s25 }
   0x4   :  { %41 = dma.hbm_to_vmem [thread:$0]  %s37_s23, 64, %s39_s25, [#allocation6]  }
   0x5   :  { %s24_s30 = sshll.u32 %s859_s29, 4  ;;  %s860_s7 = smov 512   ;;  %s25_s30 = int_to_ptr.vmem [resolvable:$true] %s24_s30 }
   0x6   :  { %s861_s8 = smov 32   ;;  %s46_s3 = sshll.u32 %s1021_s4, 4  ;;  %s47_s3 = int_to_ptr.hbm [resolvable:$true] %s46_s3 }
   0x7   :  { %30 = dma.hbm_to_vmem [thread:$0]  %s23_s28, 8192, %s25_s30, [#allocation3], %s860_s7, %s860_s7, %s861_s8  }
   0x8   :  { %s862_s11 = smov [#allocation7]   ;;  %s863_s13 = smov 128  }
   0x9   :  { %s48_s12 = sshll.u32 %s862_s11, 4  ;;  %s864_s14 = smov 8   ;;  %s49_s12 = int_to_ptr.vmem [resolvable:$true] %s48_s12 }
   0xa   :  { %54 = dma.hbm_to_vmem [thread:$0]  %s47_s3, 8192, %s49_s12, [#allocation6], %s863_s13, %s863_s13, %s864_s14  }
   0xb   :  { %852 = dma.done.wait [#allocation3], 8192  }
   0xc   :  { %853 = vsyncadd [#allocation3], 4294959104 }
   0xd   :  { %854 = dma.done.wait [#allocation6], 8256  }
   0xe   :  { %855 = vsyncadd [#allocation6], 4294959040  ;;  %v137_v0 = vld [vmem:[#allocation2 + $0x1f0] sm:$0xff]  ;;  %v138_v2 = vld [vmem:[#allocation2 + $0x1f8] sm:$0xff]  ;;  %vm689_vm0 = vcmask 1041409   ;;  %vm691_vm1 = vcmask 1042434  }
   0xf   :  { %v133_v1 = vld [vmem:[#allocation2 + $0x1d0] sm:$0xff]  ;;  %219 = vmatpush.msra.mxu2 %v137_v0  ;;  %254 = vmatpush.msra.mxu3 %v138_v2  ;;  %v134_v3 = vld [vmem:[#allocation2 + $0x1d8] sm:$0xff]  ;;  %v135_v6 = vld [vmem:[#allocation2 + $0x1e0] sm:$0xff]  ;;  %vm693_vm2 = vcmask 1043459   ;;  %vm695_vm3 = vcmask 1044484   ;;  %s708_s2 = sshll.u32 %s1023_s6, 4  ;;  %s709_s2 = int_to_ptr.hbm [resolvable:$true] %s708_s2 }
  0x10   :  { %v129_v4 = vld [vmem:[#allocation2 + $0x1b0] sm:$0xff]  ;;  %v130_v5 = vld [vmem:[#allocation2 + $0x1b8] sm:$0xff]  ;;  %v131_v7 = vld [vmem:[#allocation2 + $0x1c0] sm:$0xff]  ;;  %149 = vmatpush.msra.mxu0 %v135_v6  ;;  %vm697_vm4 = vcmask 1045509  }
  0x11   :  { %220 = vmatpush.msra.mxu2 %v133_v1  ;;  %255 = vmatpush.msra.mxu3 %v134_v3  ;;  %v136_v8 = vld [vmem:[#allocation2 + $0x1e8] sm:$0xff]  ;;  %v125_v9 = vld [vmem:[#allocation2 + $0x190] sm:$0xff]  ;;  %v126_v10 = vld [vmem:[#allocation2 + $0x198] sm:$0xff] }
  0x12   :  { %184 = vmatpush.msra.mxu1 %v136_v8  ;;  %v127_v11 = vld [vmem:[#allocation2 + $0x1a0] sm:$0xff]  ;;  %v132_v12 = vld [vmem:[#allocation2 + $0x1c8] sm:$0xff]  ;;  %v121_v13 = vld [vmem:[#allocation2 + $0x170] sm:$0xff]  ;;  %150 = vmatpush.msra.mxu0 %v131_v7 }
  0x13   :  { %221 = vmatpush.msra.mxu2 %v129_v4  ;;  %256 = vmatpush.msra.mxu3 %v130_v5  ;;  %v122_v14 = vld [vmem:[#allocation2 + $0x178] sm:$0xff]  ;;  %v128_v15 = vld [vmem:[#allocation2 + $0x1a8] sm:$0xff]  ;;  %v123_v16 = vld [vmem:[#allocation2 + $0x180] sm:$0xff] }
  0x14   :  { %185 = vmatpush.msra.mxu1 %v132_v12  ;;  %v124_v17 = vld [vmem:[#allocation2 + $0x188] sm:$0xff]  ;;  %v117_v18 = vld [vmem:[#allocation2 + $0x150] sm:$0xff]  ;;  %151 = vmatpush.msra.mxu0 %v127_v11  ;;  %v118_v19 = vld [vmem:[#allocation2 + $0x158] sm:$0xff] }
  0x15   :  { %222 = vmatpush.msra.mxu2 %v125_v9  ;;  %257 = vmatpush.msra.mxu3 %v126_v10  ;;  %v119_v20 = vld [vmem:[#allocation2 + $0x160] sm:$0xff]  ;;  %v120_v21 = vld [vmem:[#allocation2 + $0x168] sm:$0xff]  ;;  %v113_v22 = vld [vmem:[#allocation2 + $0x130] sm:$0xff] }
  0x16   :  { %186 = vmatpush.msra.mxu1 %v128_v15  ;;  %152 = vmatpush.msra.mxu0 %v123_v16  ;;  %v114_v23 = vld [vmem:[#allocation2 + $0x138] sm:$0xff]  ;;  %v115_v24 = vld [vmem:[#allocation2 + $0x140] sm:$0xff]  ;;  %v116_v25 = vld [vmem:[#allocation2 + $0x148] sm:$0xff] }
  0x17   :  { %223 = vmatpush.msra.mxu2 %v121_v13  ;;  %258 = vmatpush.msra.mxu3 %v122_v14  ;;  %v109_v26 = vld [vmem:[#allocation2 + $0x110] sm:$0xff]  ;;  %v110_v27 = vld [vmem:[#allocation2 + $0x118] sm:$0xff]  ;;  %v111_v28 = vld [vmem:[#allocation2 + $0x120] sm:$0xff] }
  0x18   :  { %187 = vmatpush.msra.mxu1 %v124_v17  ;;  %153 = vmatpush.msra.mxu0 %v119_v20  ;;  %v112_v29 = vld [vmem:[#allocation2 + $0x128] sm:$0xff]  ;;  %v105_v30 = vld [vmem:[#allocation2 + $0xf0] sm:$0xff]  ;;  %v106_v31 = vld [vmem:[#allocation2 + $0xf8] sm:$0xff] }
  0x19   :  { %224 = vmatpush.msra.mxu2 %v117_v18  ;;  %259 = vmatpush.msra.mxu3 %v118_v19  ;;  %v107_v32 = vld [vmem:[#allocation2 + $0x100] sm:$0xff]  ;;  %v108_v33 = vld [vmem:[#allocation2 + $0x108] sm:$0xff]  ;;  %v101_v34 = vld [vmem:[#allocation2 + $0xd0] sm:$0xff] }
  0x1a   :  { %188 = vmatpush.msra.mxu1 %v120_v21  ;;  %154 = vmatpush.msra.mxu0 %v115_v24  ;;  %v102_v35 = vld [vmem:[#allocation2 + $0xd8] sm:$0xff]  ;;  %v103_v36 = vld [vmem:[#allocation2 + $0xe0] sm:$0xff]  ;;  %v104_v37 = vld [vmem:[#allocation2 + $0xe8] sm:$0xff] }
  0x1b   :  { %225 = vmatpush.msra.mxu2 %v113_v22  ;;  %260 = vmatpush.msra.mxu3 %v114_v23  ;;  %v97_v38 = vld [vmem:[#allocation2 + $0xb0] sm:$0xff]  ;;  %v98_v39 = vld [vmem:[#allocation2 + $0xb8] sm:$0xff]  ;;  %v99_v40 = vld [vmem:[#allocation2 + $0xc0] sm:$0xff] }
  0x1c   :  { %189 = vmatpush.msra.mxu1 %v116_v25  ;;  %155 = vmatpush.msra.mxu0 %v111_v28  ;;  %v100_v41 = vld [vmem:[#allocation2 + $0xc8] sm:$0xff]  ;;  %v93_v42 = vld [vmem:[#allocation2 + $0x90] sm:$0xff]  ;;  %v94_v43 = vld [vmem:[#allocation2 + $0x98] sm:$0xff] }
  0x1d   :  { %226 = vmatpush.msra.mxu2 %v109_v26  ;;  %261 = vmatpush.msra.mxu3 %v110_v27  ;;  %v95_v44 = vld [vmem:[#allocation2 + $0xa0] sm:$0xff]  ;;  %v96_v45 = vld [vmem:[#allocation2 + $0xa8] sm:$0xff]  ;;  %v89_v46 = vld [vmem:[#allocation2 + $0x70] sm:$0xff] }
  0x1e   :  { %190 = vmatpush.msra.mxu1 %v112_v29  ;;  %156 = vmatpush.msra.mxu0 %v107_v32  ;;  %v90_v47 = vld [vmem:[#allocation2 + $0x78] sm:$0xff]  ;;  %v91_v48 = vld [vmem:[#allocation2 + $0x80] sm:$0xff]  ;;  %v92_v49 = vld [vmem:[#allocation2 + $0x88] sm:$0xff] }
  0x1f   :  { %227 = vmatpush.msra.mxu2 %v105_v30  ;;  %262 = vmatpush.msra.mxu3 %v106_v31  ;;  %v85_v50 = vld [vmem:[#allocation2 + $0x50] sm:$0xff]  ;;  %v86_v51 = vld [vmem:[#allocation2 + $0x58] sm:$0xff]  ;;  %v87_v52 = vld [vmem:[#allocation2 + $0x60] sm:$0xff] }
  0x20   :  { %191 = vmatpush.msra.mxu1 %v108_v33  ;;  %157 = vmatpush.msra.mxu0 %v103_v36  ;;  %v88_v53 = vld [vmem:[#allocation2 + $0x68] sm:$0xff]  ;;  %v81_v54 = vld [vmem:[#allocation2 + $0x30] sm:$0xff]  ;;  %v82_v55 = vld [vmem:[#allocation2 + $0x38] sm:$0xff] }
  0x21   :  { %228 = vmatpush.msra.mxu2 %v101_v34  ;;  %263 = vmatpush.msra.mxu3 %v102_v35  ;;  %v83_v56 = vld [vmem:[#allocation2 + $0x40] sm:$0xff]  ;;  %v84_v57 = vld [vmem:[#allocation2 + $0x48] sm:$0xff]  ;;  %v77_v58 = vld [vmem:[#allocation2 + $0x10] sm:$0xff] }
  0x22   :  { %192 = vmatpush.msra.mxu1 %v104_v37  ;;  %158 = vmatpush.msra.mxu0 %v99_v40  ;;  %v78_v59 = vld [vmem:[#allocation2 + $0x18] sm:$0xff]  ;;  %v69_v60 = vld [vmem:[%s1017_s0] sm:$0xff]  ;;  %v80_v62 = vld [vmem:[#allocation2 + $0x28] sm:$0xff] }
  0x23   :  { %229 = vmatpush.msra.mxu2 %v97_v38  ;;  %264 = vmatpush.msra.mxu3 %v98_v39  ;;  %v79_v61 = vld [vmem:[#allocation2 + $0x20] sm:$0xff]  ;;  %v76_v0 = vld [vmem:[#allocation2 + $0x8] sm:$0xff]  ;;  %v71_v2 = vld [vmem:[%s1017_s0 + $0x10] sm:$0xff] }
  0x24   :  { %193 = vmatpush.msra.mxu1 %v100_v41  ;;  %159 = vmatpush.msra.mxu0 %v95_v44  ;;  %v75_v63 = vld [vmem:[#allocation2] sm:$0xff]  ;;  %v70_v1 = vld [vmem:[%s1017_s0 + $0x8] sm:$0xff]  ;;  %v359_v6 = vld [vmem:[#allocation7 + $0x170] sm:$0xff] }
  0x25   :  { %230 = vmatpush.msra.mxu2 %v93_v42  ;;  %265 = vmatpush.msra.mxu3 %v94_v43  ;;  %v360_v3 = vld [vmem:[#allocation7 + $0x178] sm:$0xff]  ;;  %v327_v8 = vld [vmem:[#allocation7 + $0x70] sm:$0xff]  ;;  %v358_v10 = vld [vmem:[#allocation7 + $0x168] sm:$0xff] }
  0x26   :  { %194 = vmatpush.msra.mxu1 %v96_v45  ;;  %160 = vmatpush.msra.mxu0 %v91_v48  ;;  %v328_v4 = vld [vmem:[#allocation7 + $0x78] sm:$0xff]  ;;  %v375_v9 = vld [vmem:[#allocation7 + $0x1f0] sm:$0xff]  ;;  %v326_v12 = vld [vmem:[#allocation7 + $0x68] sm:$0xff] }
  0x27   :  { %231 = vmatpush.msra.mxu2 %v89_v46  ;;  %266 = vmatpush.msra.mxu3 %v90_v47  ;;  %v376_v5 = vld [vmem:[#allocation7 + $0x1f8] sm:$0xff]  ;;  %v343_v11 = vld [vmem:[#allocation7 + $0xf0] sm:$0xff]  ;;  %v374_v13 = vld [vmem:[#allocation7 + $0x1e8] sm:$0xff] }
  0x28   :  { %195 = vmatpush.msra.mxu1 %v92_v49  ;;  %161 = vmatpush.msra.mxu0 %v87_v52  ;;  %v344_v7 = vld [vmem:[#allocation7 + $0xf8] sm:$0xff]  ;;  %v357_v14 = vld [vmem:[#allocation7 + $0x160] sm:$0xff]  ;;  %v342_v15 = vld [vmem:[#allocation7 + $0xe8] sm:$0xff] }
  0x29   :  { %232 = vmatpush.msra.mxu2 %v85_v50  ;;  %267 = vmatpush.msra.mxu3 %v86_v51  ;;  %v325_v16 = vld [vmem:[#allocation7 + $0x60] sm:$0xff]  ;;  %v356_v18 = vld [vmem:[#allocation7 + $0x158] sm:$0xff]  ;;  %v355_v23 = vld [vmem:[#allocation7 + $0x150] sm:$0xff] }
  0x2a   :  { %196 = vmatpush.msra.mxu1 %v88_v53  ;;  %162 = vmatpush.msra.mxu0 %v83_v56  ;;  %v373_v17 = vld [vmem:[#allocation7 + $0x1e0] sm:$0xff]  ;;  %v324_v20 = vld [vmem:[#allocation7 + $0x58] sm:$0xff]  ;;  %v323_v25 = vld [vmem:[#allocation7 + $0x50] sm:$0xff] }
  0x2b   :  { %233 = vmatpush.msra.mxu2 %v81_v54  ;;  %268 = vmatpush.msra.mxu3 %v82_v55  ;;  %v341_v19 = vld [vmem:[#allocation7 + $0xe0] sm:$0xff]  ;;  %v72_v21 = vld [vmem:[%s1017_s0 + $0x18] sm:$0xff]  ;;  %v354_v27 = vld [vmem:[#allocation7 + $0x148] sm:$0xff] }
  0x2c   :  { %197 = vmatpush.msra.mxu1 %v84_v57  ;;  %163 = vmatpush.msra.mxu0 %v79_v61  ;;  %v372_v22 = vld [vmem:[#allocation7 + $0x1d8] sm:$0xff]  ;;  %v371_v26 = vld [vmem:[#allocation7 + $0x1d0] sm:$0xff]  ;;  %v322_v29 = vld [vmem:[#allocation7 + $0x48] sm:$0xff] }
  0x2d   :  { %234 = vmatpush.msra.mxu2 %v77_v58  ;;  %269 = vmatpush.msra.mxu3 %v78_v59  ;;  %v340_v24 = vld [vmem:[#allocation7 + $0xd8] sm:$0xff]  ;;  %v339_v28 = vld [vmem:[#allocation7 + $0xd0] sm:$0xff]  ;;  %v370_v30 = vld [vmem:[#allocation7 + $0x1c8] sm:$0xff] }
  0x2e   :  { %235 = vmatmul.f32.vlgmr.msra.gmra.mxu2 %v69_v60  ;;  %270 = vmatmul.f32.vlgmr.msra.gmra.mxu3 %v69_v60  ;;  %v353_v31 = vld [vmem:[#allocation7 + $0x140] sm:$0xff]  ;;  %v338_v32 = vld [vmem:[#allocation7 + $0xc8] sm:$0xff]  ;;  %v352_v36 = vld [vmem:[#allocation7 + $0x138] sm:$0xff] }
  0x2f   :  { %198 = vmatpush.msra.mxu1 %v80_v62  ;;  %164 = vmatpush.msra.mxu0 %v75_v63  ;;  %v321_v33 = vld [vmem:[#allocation7 + $0x40] sm:$0xff]  ;;  %v320_v38 = vld [vmem:[#allocation7 + $0x38] sm:$0xff]  ;;  %v351_v40 = vld [vmem:[#allocation7 + $0x130] sm:$0xff] }
  0x30   :  { %165 = vmatmul.f32.vlgmr.msra.gmra.mxu0 %v69_v60  ;;  %451 = vmatpush.msrb.mxu2 %v360_v3  ;;  %v73_v34 = vld [vmem:[%s1017_s0 + $0x20] sm:$0xff]  ;;  %v319_v42 = vld [vmem:[#allocation7 + $0x30] sm:$0xff]  ;;  %v350_v44 = vld [vmem:[#allocation7 + $0x128] sm:$0xff] }
  0x31   :  { %199 = vmatpush.msra.mxu1 %v76_v0  ;;  %381 = vmatpush.msrb.mxu0 %v328_v4  ;;  %v369_v35 = vld [vmem:[#allocation7 + $0x1c0] sm:$0xff]  ;;  %v368_v39 = vld [vmem:[#allocation7 + $0x1b8] sm:$0xff]  ;;  %v367_v43 = vld [vmem:[#allocation7 + $0x1b0] sm:$0xff] }
  0x32   :  { %200 = vmatmul.f32.vlgmr.msra.gmra.mxu1 %v69_v60  ;;  %486 = vmatpush.msrb.mxu3 %v376_v5  ;;  %v337_v37 = vld [vmem:[#allocation7 + $0xc0] sm:$0xff]  ;;  %v336_v41 = vld [vmem:[#allocation7 + $0xb8] sm:$0xff]  ;;  %v335_v45 = vld [vmem:[#allocation7 + $0xb0] sm:$0xff] }
  0x33   :  { %416 = vmatpush.msrb.mxu1 %v344_v7  ;;  %452 = vmatpush.msrb.mxu2 %v359_v6  ;;  %v318_v46 = vld [vmem:[#allocation7 + $0x28] sm:$0xff]  ;;  %v349_v49 = vld [vmem:[#allocation7 + $0x120] sm:$0xff]  ;;  %v348_v53 = vld [vmem:[#allocation7 + $0x118] sm:$0xff] }
  0x34   :  { %382 = vmatpush.msrb.mxu0 %v327_v8  ;;  %487 = vmatpush.msrb.mxu3 %v375_v9  ;;  %v74_v47 = vld [vmem:[%s1017_s0 + $0x28] sm:$0xff]  ;;  %v316_v55 = vld [vmem:[#allocation7 + $0x18] sm:$0xff]  ;;  %v347_v57 = vld [vmem:[#allocation7 + $0x110] sm:$0xff]  ;;  %v865_v9 = vmov 0  }
  0x35   :  { %453 = vmatpush.msrb.mxu2 %v358_v10  ;;  %417 = vmatpush.msrb.mxu1 %v343_v11  ;;  %v366_v48 = vld [vmem:[#allocation7 + $0x1a8] sm:$0xff]  ;;  %v317_v51 = vld [vmem:[#allocation7 + $0x20] sm:$0xff]  ;;  %v364_v56 = vld [vmem:[#allocation7 + $0x198] sm:$0xff] }
  0x36   :  { %238 = vmatmul.f32.gmra.mxu2 %v70_v1  ;;  %273 = vmatmul.f32.gmra.mxu3 %v70_v1  ;;  %v334_v50 = vld [vmem:[#allocation7 + $0xa8] sm:$0xff]  ;;  %v365_v52 = vld [vmem:[#allocation7 + $0x1a0] sm:$0xff]  ;;  %v332_v58 = vld [vmem:[#allocation7 + $0x98] sm:$0xff] }
  0x37   :  { %383 = vmatpush.msrb.mxu0 %v326_v12  ;;  %488 = vmatpush.msrb.mxu3 %v374_v13  ;;  %v333_v54 = vld [vmem:[#allocation7 + $0xa0] sm:$0xff]  ;;  %v315_v59 = vld [vmem:[#allocation7 + $0x10] sm:$0xff]  ;;  %v346_v61 = vld [vmem:[#allocation7 + $0x108] sm:$0xff] }
  0x38   :  { %168 = vmatmul.f32.gmra.mxu0 %v70_v1  ;;  %454 = vmatpush.msrb.mxu2 %v357_v14  ;;  %v363_v60 = vld [vmem:[#allocation7 + $0x190] sm:$0xff]  ;;  %v314_v63 = vld [vmem:[#allocation7 + $0x8] sm:$0xff]  ;;  %v313_v3 = vld [vmem:[#allocation7] sm:$0xff] }
  0x39   :  { %418 = vmatpush.msrb.mxu1 %v342_v15  ;;  %384 = vmatpush.msrb.mxu0 %v325_v16  ;;  %v331_v62 = vld [vmem:[#allocation7 + $0x90] sm:$0xff]  ;;  %v362_v0 = vld [vmem:[#allocation7 + $0x188] sm:$0xff]  ;;  %v361_v4 = vld [vmem:[#allocation7 + $0x180] sm:$0xff] }
  0x3a   :  { %203 = vmatmul.f32.gmra.mxu1 %v70_v1  ;;  %489 = vmatpush.msrb.mxu3 %v373_v17  ;;  %v345_v1 = vld [vmem:[#allocation7 + $0x100] sm:$0xff]  ;;  %v139_v10 = vld [vmem:[#allocation5] sm:$0xf] }
  0x3b   :  { %455 = vmatpush.msrb.mxu2 %v356_v18  ;;  %419 = vmatpush.msrb.mxu1 %v341_v19  ;;  %v329_v5 = vld [vmem:[#allocation7 + $0x80] sm:$0xff]  ;;  %v932_v11 = vperm.slane %v139_v10, 0  ;;  %v934_v12 = vperm.slane %v139_v10, 1  ;;  %v936_v13 = vperm.slane %v139_v10, 2  ;;  %v938_v14 = vperm.slane %v139_v10, 3 }
  0x3c   :  { %385 = vmatpush.msrb.mxu0 %v324_v20  ;;  %490 = vmatpush.msrb.mxu3 %v372_v22  ;;  %v521_v6 = vld [vmem:[%s1018_s1] sm:$0xff]  ;;  %v522_v15 = vld [vmem:[%s1018_s1 + $0x8] sm:$0xff] }
  0x3d   :  { %456 = vmatpush.msrb.mxu2 %v355_v23  ;;  %420 = vmatpush.msrb.mxu1 %v340_v24  ;;  %v527_v7 = vsub.f32 1.0, %v521_v6  ;;  %v528_v18 = vsub.f32 1.0, %v522_v15 }
  0x3e   :  { %241 = vmatmul.f32.gmra.mxu2 %v71_v2  ;;  %276 = vmatmul.f32.gmra.mxu3 %v71_v2 }
  0x3f   :  { %386 = vmatpush.msrb.mxu0 %v323_v25  ;;  %491 = vmatpush.msrb.mxu3 %v371_v26  ;;  %v533_v8 = vmul.f32 1e+10, %v527_v7  ;;  %v534_v23 = vmul.f32 1e+10, %v528_v18 }
  0x40   :  { %171 = vmatmul.f32.gmra.mxu0 %v71_v2  ;;  %457 = vmatpush.msrb.mxu2 %v354_v27 }
  0x41   :  { %421 = vmatpush.msrb.mxu1 %v339_v28  ;;  %387 = vmatpush.msrb.mxu0 %v322_v29 }
  0x42   :  { %206 = vmatmul.f32.gmra.mxu1 %v71_v2  ;;  %492 = vmatpush.msrb.mxu3 %v370_v30  ;;  %v330_v2 = vld [vmem:[#allocation7 + $0x88] sm:$0xff] }
  0x43   :  { %458 = vmatpush.msrb.mxu2 %v353_v31  ;;  %422 = vmatpush.msrb.mxu1 %v338_v32  ;;  %v523_v30 = vld [vmem:[%s1018_s1 + $0x10] sm:$0xff] }
  0x44   :  { %388 = vmatpush.msrb.mxu0 %v321_v33  ;;  %493 = vmatpush.msrb.mxu3 %v369_v35  ;;  %v529_v33 = vsub.f32 1.0, %v523_v30 }
  0x45   :  { %459 = vmatpush.msrb.mxu2 %v352_v36  ;;  %423 = vmatpush.msrb.mxu1 %v337_v37 }
  0x46   :  { %244 = vmatmul.f32.gmra.mxu2 %v72_v21  ;;  %279 = vmatmul.f32.gmra.mxu3 %v72_v21 }
  0x47   :  { %389 = vmatpush.msrb.mxu0 %v320_v38  ;;  %494 = vmatpush.msrb.mxu3 %v368_v39  ;;  %v535_v38 = vmul.f32 1e+10, %v529_v33 }
  0x48   :  { %174 = vmatmul.f32.gmra.mxu0 %v72_v21  ;;  %460 = vmatpush.msrb.mxu2 %v351_v40 }
  0x49   :  { %424 = vmatpush.msrb.mxu1 %v336_v41  ;;  %390 = vmatpush.msrb.mxu0 %v319_v42 }
  0x4a   :  { %209 = vmatmul.f32.gmra.mxu1 %v72_v21  ;;  %495 = vmatpush.msrb.mxu3 %v367_v43 }
  0x4b   :  { %461 = vmatpush.msrb.mxu2 %v350_v44  ;;  %425 = vmatpush.msrb.mxu1 %v335_v45  ;;  %v524_v45 = vld [vmem:[%s1018_s1 + $0x18] sm:$0xff] }
  0x4c   :  { %391 = vmatpush.msrb.mxu0 %v318_v46  ;;  %496 = vmatpush.msrb.mxu3 %v366_v48  ;;  %v525_v46 = vld [vmem:[%s1018_s1 + $0x20] sm:$0xff] }
  0x4d   :  { %462 = vmatpush.msrb.mxu2 %v349_v49  ;;  %426 = vmatpush.msrb.mxu1 %v334_v50  ;;  %v530_v49 = vsub.f32 1.0, %v524_v45  ;;  %v531_v50 = vsub.f32 1.0, %v525_v46 }
  0x4e   :  { %247 = vmatmul.f32.gmra.mxu2 %v73_v34  ;;  %282 = vmatmul.f32.gmra.mxu3 %v73_v34 }
  0x4f   :  { %392 = vmatpush.msrb.mxu0 %v317_v51  ;;  %497 = vmatpush.msrb.mxu3 %v365_v52 }
  0x50   :  { %177 = vmatmul.f32.gmra.mxu0 %v73_v34  ;;  %463 = vmatpush.msrb.mxu2 %v348_v53  ;;  %v526_v53 = vld [vmem:[%s1018_s1 + $0x28] sm:$0xff] }
  0x51   :  { %427 = vmatpush.msrb.mxu1 %v333_v54  ;;  %393 = vmatpush.msrb.mxu0 %v316_v55 }
  0x52   :  { %212 = vmatmul.f32.gmra.mxu1 %v73_v34  ;;  %498 = vmatpush.msrb.mxu3 %v364_v56  ;;  %v536_v56 = vmul.f32 1e+10, %v530_v49 }
  0x53   :  { %464 = vmatpush.msrb.mxu2 %v347_v57  ;;  %428 = vmatpush.msrb.mxu1 %v332_v58  ;;  %v537_v57 = vmul.f32 1e+10, %v531_v50 }
  0x54   :  { %394 = vmatpush.msrb.mxu0 %v315_v59  ;;  %499 = vmatpush.msrb.mxu3 %v363_v60 }
  0x55   :  { %465 = vmatpush.msrb.mxu2 %v346_v61  ;;  %429 = vmatpush.msrb.mxu1 %v331_v62  ;;  %v532_v62 = vsub.f32 1.0, %v526_v53 }
  0x56   :  { %250 = vmatmul.f32.gmra.mxu2 %v74_v47  ;;  %285 = vmatmul.f32.gmra.mxu3 %v74_v47 }
  0x57   :  { %395 = vmatpush.msrb.mxu0 %v314_v63  ;;  %500 = vmatpush.msrb.mxu3 %v362_v0 }
  0x58   :  { %180 = vmatmul.f32.gmra.mxu0 %v74_v47  ;;  %466 = vmatpush.msrb.mxu2 %v345_v1 }
  0x59   :  { %430 = vmatpush.msrb.mxu1 %v330_v2  ;;  %396 = vmatpush.msrb.mxu0 %v313_v3  ;;  %v538_v3 = vmul.f32 1e+10, %v532_v62 }
  0x5a   :  { %215 = vmatmul.f32.gmra.mxu1 %v74_v47  ;;  %501 = vmatpush.msrb.mxu3 %v361_v4 }
  0x5b   :  { %431 = vmatpush.msrb.mxu1 %v329_v5  ;;  %728 = vset.pattern.permute.xlu0 %v865_v9 }
  0x5c   :  { %729 = vset.pattern.permute.xlu1 %v865_v9  ;;  %541 = vperm.xlu0 %728, %v533_v8  }
  0x5d   :  { %730 = vset.pattern.permute.xlu2 %v865_v9  ;;  %551 = vperm.xlu1 %729, %v535_v38  }
  0x5e   :  { %561 = vperm.xlu2 %730, %v537_v57  }
  0x64   :  { %546 = vperm.xlu0 %728, %v534_v23  }
  0x65   :  { %556 = vperm.xlu1 %729, %v536_v56  }
  0x66   :  { %566 = vperm.xlu2 %730, %v538_v3  }
  0xad   :  { %v166_v16 = vpop.f32.mrf.mxu0 }
  0xae   :  { %v167_v19 = vadd.f32 %v166_v16, %v932_v11 }
  0xaf   :  { %v201_v17 = vpop.f32.mrf.mxu1 }
  0xb0   :  { %v202_v20 = vadd.f32 %v201_v17, %v934_v12  ;;  %v289_v25 = vmax.f32 %v167_v19, 0.0 }
  0xb1   :  { %v236_v21 = vpop.f32.mrf.mxu2  ;;  %v271_v22 = vpop.f32.mrf.mxu3 }
  0xb2   :  { %v237_v24 = vadd.f32 %v236_v21, %v936_v13  ;;  %v272_v26 = vadd.f32 %v271_v22, %v938_v14  ;;  %v290_v27 = vmax.f32 %v202_v20, 0.0  ;;  %397 = vmatmul.f32.vlgmr.msrb.gmra.mxu0 %v289_v25 }
  0xb4   :  { %v291_v28 = vmax.f32 %v237_v24, 0.0  ;;  %v292_v29 = vmax.f32 %v272_v26, 0.0  ;;  %432 = vmatmul.f32.vlgmr.msrb.gmra.mxu1 %v290_v27 }
  0xb5   :  { %v169_v31 = vpop.f32.mrf.mxu0 }
  0xb6   :  { %467 = vmatmul.f32.vlgmr.msrb.gmra.mxu2 %v291_v28  ;;  %502 = vmatmul.f32.vlgmr.msrb.gmra.mxu3 %v292_v29  ;;  %v170_v34 = vadd.f32 %v169_v31, %v932_v11 }
  0xb7   :  { %v204_v32 = vpop.f32.mrf.mxu1 }
  0xb8   :  { %v205_v35 = vadd.f32 %v204_v32, %v934_v12  ;;  %v293_v40 = vmax.f32 %v170_v34, 0.0 }
  0xb9   :  { %v239_v36 = vpop.f32.mrf.mxu2  ;;  %v274_v37 = vpop.f32.mrf.mxu3 }
  0xba   :  { %v240_v39 = vadd.f32 %v239_v36, %v936_v13  ;;  %v275_v41 = vadd.f32 %v274_v37, %v938_v14  ;;  %v294_v42 = vmax.f32 %v205_v35, 0.0  ;;  %400 = vmatmul.f32.gmra.mxu0 %v293_v40 }
  0xbc   :  { %v295_v43 = vmax.f32 %v240_v39, 0.0  ;;  %v296_v44 = vmax.f32 %v275_v41, 0.0  ;;  %435 = vmatmul.f32.gmra.mxu1 %v294_v42 }
  0xbd   :  { %v172_v47 = vpop.f32.mrf.mxu0 }
  0xbe   :  { %470 = vmatmul.f32.gmra.mxu2 %v295_v43  ;;  %505 = vmatmul.f32.gmra.mxu3 %v296_v44  ;;  %v173_v51 = vadd.f32 %v172_v47, %v932_v11 }
  0xbf   :  { %v207_v48 = vpop.f32.mrf.mxu1 }
  0xc0   :  { %v208_v52 = vadd.f32 %v207_v48, %v934_v12  ;;  %v297_v59 = vmax.f32 %v173_v51, 0.0 }
  0xc1   :  { %v242_v54 = vpop.f32.mrf.mxu2  ;;  %v277_v55 = vpop.f32.mrf.mxu3 }
  0xc2   :  { %v243_v58 = vadd.f32 %v242_v54, %v936_v13  ;;  %v278_v60 = vadd.f32 %v277_v55, %v938_v14  ;;  %v298_v61 = vmax.f32 %v208_v52, 0.0  ;;  %403 = vmatmul.f32.gmra.mxu0 %v297_v59 }
  0xc4   :  { %v299_v63 = vmax.f32 %v243_v58, 0.0  ;;  %v300_v0 = vmax.f32 %v278_v60, 0.0  ;;  %438 = vmatmul.f32.gmra.mxu1 %v298_v61 }
  0xc5   :  { %v175_v1 = vpop.f32.mrf.mxu0 }
  0xc6   :  { %473 = vmatmul.f32.gmra.mxu2 %v299_v63  ;;  %508 = vmatmul.f32.gmra.mxu3 %v300_v0  ;;  %v176_v4 = vadd.f32 %v175_v1, %v932_v11 }
  0xc7   :  { %v210_v2 = vpop.f32.mrf.mxu1 }
  0xc8   :  { %v211_v5 = vadd.f32 %v210_v2, %v934_v12  ;;  %v301_v9 = vmax.f32 %v176_v4, 0.0 }
  0xc9   :  { %v245_v6 = vpop.f32.mrf.mxu2  ;;  %v280_v7 = vpop.f32.mrf.mxu3 }
  0xca   :  { %v246_v8 = vadd.f32 %v245_v6, %v936_v13  ;;  %v281_v10 = vadd.f32 %v280_v7, %v938_v14  ;;  %v302_v15 = vmax.f32 %v211_v5, 0.0  ;;  %406 = vmatmul.f32.gmra.mxu0 %v301_v9 }
  0xcc   :  { %v303_v16 = vmax.f32 %v246_v8, 0.0  ;;  %v304_v17 = vmax.f32 %v281_v10, 0.0  ;;  %441 = vmatmul.f32.gmra.mxu1 %v302_v15 }
  0xcd   :  { %v178_v18 = vpop.f32.mrf.mxu0 }
  0xce   :  { %476 = vmatmul.f32.gmra.mxu2 %v303_v16  ;;  %511 = vmatmul.f32.gmra.mxu3 %v304_v17  ;;  %v179_v20 = vadd.f32 %v178_v18, %v932_v11  ;;  %v542_v44 = vpop.permute.xlu0 %541 }
  0xcf   :  { %v213_v19 = vpop.f32.mrf.mxu1  ;;  %v552_v3 = vpop.permute.xlu1 %551 }
  0xd0   :  { %v214_v21 = vadd.f32 %v213_v19, %v934_v12  ;;  %v305_v25 = vmax.f32 %v179_v20, 0.0 }
  0xd1   :  { %v248_v22 = vpop.f32.mrf.mxu2  ;;  %v283_v23 = vpop.f32.mrf.mxu3 }
  0xd2   :  { %v249_v24 = vadd.f32 %v248_v22, %v936_v13  ;;  %v284_v26 = vadd.f32 %v283_v23, %v938_v14  ;;  %v306_v27 = vmax.f32 %v214_v21, 0.0  ;;  %409 = vmatmul.f32.gmra.mxu0 %v305_v25 }
  0xd4   :  { %v307_v28 = vmax.f32 %v249_v24, 0.0  ;;  %v308_v29 = vmax.f32 %v284_v26, 0.0  ;;  %444 = vmatmul.f32.gmra.mxu1 %v306_v27 }
  0xd5   :  { %v181_v30 = vpop.f32.mrf.mxu0 }
  0xd6   :  { %479 = vmatmul.f32.gmra.mxu2 %v307_v28  ;;  %514 = vmatmul.f32.gmra.mxu3 %v308_v29  ;;  %v182_v32 = vadd.f32 %v181_v30, %v932_v11  ;;  %v982_v11 = vld [vmem:[%s1022_s5] ss:$0 sm:$0xff]  ;;  %v547_v60 = vpop.permute.xlu0 %546  ;;  %s866_s5 = smov [#allocation8]  }
  0xd7   :  { %v216_v31 = vpop.f32.mrf.mxu1  ;;  %s706_s12 = sshll.u32 %s866_s5, 4  ;;  %s707_s12 = int_to_ptr.vmem [resolvable:$true] %s706_s12 }
  0xd8   :  { %v217_v33 = vadd.f32 %v216_v31, %v934_v12  ;;  %v309_v37 = vmax.f32 %v182_v32, 0.0  ;;  %v557_v31 = vpop.permute.xlu1 %556 }
  0xd9   :  { %v251_v34 = vpop.f32.mrf.mxu2  ;;  %v286_v35 = vpop.f32.mrf.mxu3 }
  0xda   :  { %v252_v36 = vadd.f32 %v251_v34, %v936_v13  ;;  %v287_v38 = vadd.f32 %v286_v35, %v938_v14  ;;  %v310_v39 = vmax.f32 %v217_v33, 0.0  ;;  %412 = vmatmul.f32.gmra.mxu0 %v309_v37 }
  0xdc   :  { %v311_v40 = vmax.f32 %v252_v36, 0.0  ;;  %v312_v41 = vmax.f32 %v287_v38, 0.0  ;;  %447 = vmatmul.f32.gmra.mxu1 %v310_v39 }
  0xde   :  { %482 = vmatmul.f32.gmra.mxu2 %v311_v40  ;;  %517 = vmatmul.f32.gmra.mxu3 %v312_v41 }
 0x12f   :  { %v398_v12 = vpop.f32.mrf.mxu0 }
 0x130   :  { %v399_v43 = vadd.f32 %v982_v11, %v398_v12 }
 0x131   :  { %v433_v42 = vpop.f32.mrf.mxu1 }
 0x132   :  { %v434_v13 = vadd.f32 %v433_v42, %v399_v43 }
 0x137   :  { %v401_v47 = vpop.f32.mrf.mxu0 }
 0x138   :  { %v402_v49 = vadd.f32 %v982_v11, %v401_v47  ;;  %v562_v47 = vpop.permute.xlu2 %561 }
 0x139   :  { %v468_v45 = vpop.f32.mrf.mxu2  ;;  %v503_v14 = vpop.f32.mrf.mxu3 }
 0x13a   :  { %v469_v46 = vadd.f32 %v468_v45, %v434_v13  ;;  %v436_v48 = vpop.f32.mrf.mxu1 }
 0x13b   :  { %v437_v52 = vadd.f32 %v436_v48, %v402_v49 }
 0x13c   :  { %v504_v50 = vadd.f32 %v503_v14, %v469_v46 }
 0x13e   :  { %v569_v51 = vsub.f32 %v504_v50, %v542_v44 }
 0x13f   :  { %v404_v57 = vpop.f32.mrf.mxu0 }
 0x140   :  { %v575_v53 = vrot.slane %v569_v51, 4  ;;  %v405_v61 = vadd.f32 %v982_v11, %v404_v57 }
 0x141   :  { %v471_v54 = vpop.f32.mrf.mxu2  ;;  %v506_v55 = vpop.f32.mrf.mxu3 }
 0x142   :  { %v472_v56 = vadd.f32 %v471_v54, %v437_v52  ;;  %v439_v58 = vpop.f32.mrf.mxu1  ;;  %v576_v59 = vmax.f32 %v569_v51, %v575_v53 }
 0x143   :  { %v440_v0 = vadd.f32 %v439_v58, %v405_v61 }
 0x144   :  { %v507_v62 = vadd.f32 %v506_v55, %v472_v56  ;;  %v577_v1 = vrot.slane %v576_v59, 2 }
 0x146   :  { %v570_v63 = vsub.f32 %v507_v62, %v547_v60  ;;  %v578_v10 = vmax.f32 %v576_v59, %v577_v1 }
 0x147   :  { %v407_v8 = vpop.f32.mrf.mxu0 }
 0x148   :  { %v581_v2 = vrot.slane %v570_v63, 4  ;;  %v408_v15 = vadd.f32 %v982_v11, %v407_v8  ;;  %v579_v21 = vrot.slane %v578_v10, 1 }
 0x149   :  { %v474_v4 = vpop.f32.mrf.mxu2  ;;  %v509_v5 = vpop.f32.mrf.mxu3 }
 0x14a   :  { %v582_v6 = vmax.f32 %v570_v63, %v581_v2  ;;  %v475_v7 = vadd.f32 %v474_v4, %v440_v0  ;;  %v442_v9 = vpop.f32.mrf.mxu1  ;;  %v988_v30 = vmax.f32 %v578_v10, %v579_v21  ;;  %v567_v4 = vpop.permute.xlu2 %566 }
 0x14b   :  { %v443_v20 = vadd.f32 %v442_v9, %v408_v15 }
 0x14c   :  { %v583_v16 = vrot.slane %v582_v6, 2  ;;  %v510_v17 = vadd.f32 %v509_v5, %v475_v7  ;;  %v611_v39 = vsub.f32 %v569_v51, %v988_v30 }
 0x14e   :  { %v584_v18 = vmax.f32 %v582_v6, %v583_v16  ;;  %v571_v19 = vsub.f32 %v510_v17, %v552_v3  ;;  %v617_v46 = vmul.f32 1.442695, %v611_v39 }
 0x14f   :  { %v410_v28 = vpop.f32.mrf.mxu0 }
 0x150   :  { %v585_v22 = vrot.slane %v584_v18, 1  ;;  %v587_v23 = vrot.slane %v571_v19, 4  ;;  %v411_v32 = vadd.f32 %v982_v11, %v410_v28  ;;  %732 = vpow2.f32 %v617_v46 }
 0x151   :  { %v477_v24 = vpop.f32.mrf.mxu2  ;;  %v512_v25 = vpop.f32.mrf.mxu3 }
 0x152   :  { %v588_v26 = vmax.f32 %v571_v19, %v587_v23  ;;  %v478_v27 = vadd.f32 %v477_v24, %v443_v20  ;;  %v445_v29 = vpop.f32.mrf.mxu1  ;;  %v991_v33 = vmax.f32 %v584_v18, %v585_v22 }
 0x153   :  { %v446_v38 = vadd.f32 %v445_v29, %v411_v32 }
 0x154   :  { %v589_v34 = vrot.slane %v588_v26, 2  ;;  %v513_v35 = vadd.f32 %v512_v25, %v478_v27  ;;  %v612_v40 = vsub.f32 %v570_v63, %v991_v33 }
 0x156   :  { %v590_v36 = vmax.f32 %v588_v26, %v589_v34  ;;  %v572_v37 = vsub.f32 %v513_v35, %v557_v31  ;;  %v619_v50 = vmul.f32 1.442695, %v612_v40  ;;  %v733_v3 = vpop.eup %732 }
 0x157   :  { %v413_v14 = vpop.f32.mrf.mxu0  ;;  %v629_v10 = vrot.slane %v733_v3, 4 }
 0x158   :  { %v591_v41 = vrot.slane %v590_v36, 1  ;;  %v593_v12 = vrot.slane %v572_v37, 4  ;;  %v414_v48 = vadd.f32 %v982_v11, %v413_v14  ;;  %734 = vpow2.f32 %v619_v50 }
 0x159   :  { %v480_v42 = vpop.f32.mrf.mxu2  ;;  %v515_v43 = vpop.f32.mrf.mxu3  ;;  %v630_v21 = vadd.f32 %v733_v3, %v629_v10 }
 0x15a   :  { %v995_v13 = vmax.f32 %v590_v36, %v591_v41  ;;  %v594_v44 = vmax.f32 %v572_v37, %v593_v12  ;;  %v481_v45 = vadd.f32 %v480_v42, %v446_v38  ;;  %v448_v49 = vpop.f32.mrf.mxu1 }
 0x15b   :  { %v449_v57 = vadd.f32 %v448_v49, %v414_v48  ;;  %v631_v31 = vrot.slane %v630_v21, 2 }
 0x15c   :  { %v613_v52 = vsub.f32 %v571_v19, %v995_v13  ;;  %v595_v51 = vrot.slane %v594_v44, 2  ;;  %v516_v53 = vadd.f32 %v515_v43, %v481_v45 }
 0x15d   :  { %v632_v39 = vadd.f32 %v631_v31, %v630_v21 }
 0x15e   :  { %v621_v54 = vmul.f32 1.442695, %v613_v52  ;;  %v596_v55 = vmax.f32 %v594_v44, %v595_v51  ;;  %v573_v56 = vsub.f32 %v516_v53, %v562_v47  ;;  %v735_v5 = vpop.eup %734 }
 0x15f   :  { %v635_v17 = vrot.slane %v735_v5, 4  ;;  %v633_v14 = vrot.slane %v632_v39, 1 }
 0x160   :  { %v597_v58 = vrot.slane %v596_v55, 1  ;;  %v599_v59 = vrot.slane %v573_v56, 4  ;;  %736 = vpow2.f32 %v621_v54 }
 0x161   :  { %v483_v60 = vpop.f32.mrf.mxu2  ;;  %v518_v61 = vpop.f32.mrf.mxu3  ;;  %v636_v24 = vadd.f32 %v735_v5, %v635_v17  ;;  %v634_v52 = vadd.f32 %v633_v14, %v632_v39 }
 0x162   :  { %v999_v62 = vmax.f32 %v596_v55, %v597_v58  ;;  %v600_v11 = vmax.f32 %v573_v56, %v599_v59  ;;  %v484_v63 = vadd.f32 %v483_v60, %v449_v57 }
 0x163   :  { %v637_v34 = vrot.slane %v636_v24, 2 }
 0x164   :  { %v614_v0 = vsub.f32 %v572_v37, %v999_v62  ;;  %v601_v1 = vrot.slane %v600_v11, 2  ;;  %v519_v2 = vadd.f32 %v518_v61, %v484_v63 }
 0x165   :  { %v638_v41 = vadd.f32 %v637_v34, %v636_v24 }
 0x166   :  { %v623_v6 = vmul.f32 1.442695, %v614_v0  ;;  %v602_v7 = vmax.f32 %v600_v11, %v601_v1  ;;  %v574_v8 = vsub.f32 %v519_v2, %v567_v4  ;;  %v737_v9 = vpop.eup %736 }
 0x167   :  { %v641_v18 = vrot.slane %v737_v9, 4  ;;  %v639_v46 = vrot.slane %v638_v41, 1 }
 0x168   :  { %738 = vpow2.f32 %v623_v6  ;;  %v603_v15 = vrot.slane %v602_v7, 1  ;;  %v605_v16 = vrot.slane %v574_v8, 4 }
 0x169   :  { %v642_v26 = vadd.f32 %v737_v9, %v641_v18  ;;  %v640_v51 = vadd.f32 %v639_v46, %v638_v41 }
 0x16a   :  { %v1002_v19 = vmax.f32 %v602_v7, %v603_v15  ;;  %v606_v20 = vmax.f32 %v574_v8, %v605_v16 }
 0x16b   :  { %v643_v36 = vrot.slane %v642_v26, 2 }
 0x16c   :  { %v615_v22 = vsub.f32 %v573_v56, %v1002_v19  ;;  %v607_v23 = vrot.slane %v606_v20, 2 }
 0x16d   :  { %v644_v42 = vadd.f32 %v643_v36, %v642_v26 }
 0x16e   :  { %v739_v25 = vpop.eup %738  ;;  %v625_v27 = vmul.f32 1.442695, %v615_v22  ;;  %v608_v28 = vmax.f32 %v606_v20, %v607_v23 }
 0x16f   :  { %v647_v29 = vrot.slane %v739_v25, 4  ;;  %v645_v48 = vrot.slane %v644_v42, 1 }
 0x170   :  { %740 = vpow2.f32 %v625_v27  ;;  %v609_v32 = vrot.slane %v608_v28, 1 }
 0x171   :  { %v648_v35 = vadd.f32 %v739_v25, %v647_v29  ;;  %v646_v55 = vadd.f32 %v645_v48, %v644_v42 }
 0x172   :  { %v1005_v37 = vmax.f32 %v608_v28, %v609_v32 }
 0x173   :  { %v649_v38 = vrot.slane %v648_v35, 2 }
 0x174   :  { %v616_v40 = vsub.f32 %v574_v8, %v1005_v37 }
 0x175   :  { %v650_v44 = vadd.f32 %v649_v38, %v648_v35 }
 0x176   :  { %v741_v12 = vpop.eup %740  ;;  %v627_v43 = vmul.f32 1.442695, %v616_v40 }
 0x177   :  { %v653_v45 = vrot.slane %v741_v12, 4  ;;  %v651_v49 = vrot.slane %v650_v44, 1 }
 0x178   :  { %742 = vpow2.f32 %v627_v43 }
 0x179   :  { %v654_v47 = vadd.f32 %v741_v12, %v653_v45  ;;  %v652_v56 = vadd.f32 %v651_v49, %v650_v44  ;;  %744 = vlog2.f32 %v634_v52 }
 0x17a   :  { %746 = vlog2.f32 %v640_v51 }
 0x17b   :  { %v655_v50 = vrot.slane %v654_v47, 2  ;;  %748 = vlog2.f32 %v646_v55 }
 0x17c   :  { %750 = vlog2.f32 %v652_v56 }
 0x17d   :  { %v656_v53 = vadd.f32 %v655_v50, %v654_v47 }
 0x17e   :  { %v743_v54 = vpop.eup %742 }
 0x17f   :  { %v657_v57 = vrot.slane %v656_v53, 1  ;;  %v659_v58 = vrot.slane %v743_v54, 4  ;;  %v745_v63 = vpop.eup %744 }
 0x180   :  { %v747_v0 = vpop.eup %746  ;;  %v666_v8 = vmul.f32 0.6931472, %v745_v63 }
 0x181   :  { %v658_v59 = vadd.f32 %v657_v57, %v656_v53  ;;  %v660_v60 = vadd.f32 %v743_v54, %v659_v58  ;;  %v749_v2 = vpop.eup %748  ;;  %v668_v6 = vmul.f32 0.6931472, %v747_v0 }
 0x182   :  { %v751_v3 = vpop.eup %750  ;;  %v670_v7 = vmul.f32 0.6931472, %v749_v2  ;;  %v677_v17 = vadd.f32 %v666_v8, %v988_v30 }
 0x183   :  { %v661_v61 = vrot.slane %v660_v60, 2  ;;  %752 = vlog2.f32 %v658_v59  ;;  %v672_v9 = vmul.f32 0.6931472, %v751_v3  ;;  %v678_v15 = vadd.f32 %v668_v6, %v991_v33 }
 0x184   :  { %v679_v16 = vadd.f32 %v670_v7, %v995_v13 }
 0x185   :  { %v662_v11 = vadd.f32 %v661_v61, %v660_v60  ;;  %v680_v18 = vadd.f32 %v672_v9, %v999_v62  ;;  %v690_v23 = vsel %vm689_vm0, %v678_v15, %v677_v17 }
 0x186   :  { %v692_v33 = vsel %vm691_vm1, %v679_v16, %v690_v23 }
 0x187   :  { %v663_v1 = vrot.slane %v662_v11, 1  ;;  %v694_v13 = vsel %vm693_vm2, %v680_v18, %v692_v33 }
 0x189   :  { %v664_v4 = vadd.f32 %v663_v1, %v662_v11  ;;  %v753_v5 = vpop.eup %752 }
 0x18a   :  { %v674_v10 = vmul.f32 0.6931472, %v753_v5 }
 0x18b   :  { %754 = vlog2.f32 %v664_v4 }
 0x18c   :  { %v681_v21 = vadd.f32 %v674_v10, %v1002_v19 }
 0x18e   :  { %v696_v62 = vsel %vm695_vm3, %v681_v21, %v694_v13 }
 0x191   :  { %v755_v20 = vpop.eup %754 }
 0x192   :  { %v676_v22 = vmul.f32 0.6931472, %v755_v20 }
 0x194   :  { %v682_v30 = vadd.f32 %v676_v22, %v1005_v37 }
 0x196   :  { %v698_v24 = vsel %vm697_vm4, %v682_v30, %v696_v62 }
 0x197   :  { %700 = vst [vmem:[#allocation8] sm:$0x3f] %v698_v24 }
 0x198   :  { %711 = dma.vmem_to_hbm [thread:$0]  %s707_s12, 128, %s709_s2, [#allocation4]  }
 0x199   :  { %856 = dma.done.wait [#allocation4], 128  }
 0x19a   :  { %857 = vsyncadd [#allocation4], 4294967168 }
 0x19b   :  { %716 = vsyncpa [#allocation3], 1 }
 0x19c   :  { %717 = vsyncpa [#allocation6], 1 }
 0x19d   :  { %718 = vsyncpa [#allocation4], 1 }

</bundles_post_ra>
